<compile_context>
chip_gen: v6e
topology: v6e:2x2x1
jax: 0.10.0
libtpu: 0.0.40
codegen_flags: <defaults>
</compile_context>

<pallas_src>
import jax
import jax.numpy as jnp
from jax.experimental import pallas as pl
from jax.experimental.pallas import tpu as pltpu  # noqa: F401  (TPU backend assumed)


def ensemble_kernel(xf_ref, w_ref, b_ref, out_ref):
    # Single lane-dense MXU matmul + bias; all operands resident in VMEM.
    out_ref[...] = (
        jnp.dot(xf_ref[...], w_ref[...], preferred_element_type=jnp.float32)
        + b_ref[...]
    ).astype(out_ref.dtype)


def _full_spec(shape):
    # Whole-array block (empty grid -> index_map takes no args).
    return pl.BlockSpec(shape, lambda: (0,) * len(shape))


def fold_params(params, H, W):
    """Fold (mean-pool -> Linear), (flatten -> Linear), concat and the classifier
    into a single affine map acting on the flattened (B, C*H*W) input.

    mean-pool + Linear(C->F1) on channel c is equivalent to a matmul against
    w1[c, :]/(H*W) replicated across that channel's H*W flattened positions.
    """
    w1, b1 = params["w1"], params["b1"]      # (C, F1), (1, F1)
    w2, b2 = params["w2"], params["b2"]      # (C*H*W, F2), (1, F2)
    wc, bc = params["wc"], params["bc"]      # (F1+F2, NC), (1, NC)
    HW = H * W

    w1_exp = jnp.repeat(w1, HW, axis=0) / float(HW)          # (C*H*W, F1)
    w_fused = jnp.concatenate([w1_exp, w2], axis=1)          # (C*H*W, F1+F2)
    b_fused = jnp.concatenate([b1, b2], axis=1)               # (1, F1+F2)

    # Do the (one-time) host-side fold at full precision.
    hi = jax.lax.Precision.HIGHEST
    w_all = jnp.dot(w_fused, wc, precision=hi)                # (C*H*W, NC)
    b_all = jnp.dot(b_fused, wc, precision=hi) + bc           # (1, NC)
    return w_all, b_all


def ensemble_forward(x, w_all, b_all):
    """x: (B, C, H, W) float32; w_all/b_all: pre-folded affine parameters."""
    B = x.shape[0]
    xf = x.reshape(B, -1)          # host-side flatten: lane-dense, C*H*W = 1024
    NC = w_all.shape[1]
    return pl.pallas_call(
        ensemble_kernel,
        out_shape=jax.ShapeDtypeStruct((B, NC), jnp.float32),
        in_specs=[
            _full_spec(xf.shape),
            _full_spec(w_all.shape),
            _full_spec(b_all.shape),
        ],
        out_specs=_full_spec((B, NC)),
    )(xf, w_all, b_all)


def init_params(key, C, H, W, F1, F2, num_classes):
    """Deterministic synthetic params (PyTorch Linear is (out, in); stored here
    already transposed to (in, out) so matmuls are plain row-major)."""
    k1, k2, k3, k4, k5, k6 = jax.random.split(key, 6)
    in_features = F1 + F2
    return {
        "w1": jax.random.normal(k1, (C, F1), jnp.float32) * 0.1,
        "b1": jax.random.normal(k2, (1, F1), jnp.float32) * 0.1,
        "w2": jax.random.normal(k3, (C * H * W, F2), jnp.float32) * 0.02,
        "b2": jax.random.normal(k4, (1, F2), jnp.float32) * 0.1,
        "wc": jax.random.normal(k5, (in_features, num_classes), jnp.float32) * 0.1,
        "bc": jax.random.normal(k6, (1, num_classes), jnp.float32) * 0.1,
    }


def reference_forward(x, params):
    """Pure-JAX reference mirroring the PyTorch forward (unfused)."""
    B = x.shape[0]
    x1 = jnp.mean(x, axis=(2, 3)) @ params["w1"] + params["b1"]
    x2 = x.reshape(B, -1) @ params["w2"] + params["b2"]
    feats = jnp.concatenate([x1, x2], axis=1)
    return feats @ params["wc"] + params["bc"]


if __name__ == "__main__":
    B, C, H, W = 2, 4, 16, 16
    F1, F2, NUM_CLASSES = 32, 32, 4

    key = jax.random.PRNGKey(0)
    kx, kp = jax.random.split(key)
    x = jax.random.normal(kx, (B, C, H, W), jnp.float32)
    params = init_params(kp, C, H, W, F1, F2, NUM_CLASSES)

    # One-time host-side affine fold (reused across forward calls).
    w_all, b_all = fold_params(params, H, W)

    out = ensemble_forward(x, w_all, b_all)
    out = jax.block_until_ready(out)

    ref = reference_forward(x, params)
    assert out.shape == (B, NUM_CLASSES)
    # Tolerance covers (a) f32 summation reordering from the affine weight fold
    # and (b) possible bf16 operand rounding on the MXU at default matmul
    # precision; with full-f32 matmuls the actual difference is ~1e-6.
    assert jnp.allclose(out, ref, atol=1e-2, rtol=1e-2), "mismatch vs reference"

    print("KERNEL_OK")
</pallas_src>

<mosaic_0001>
module attributes {stable_mosaic.version = 11 : i64} {
  func.func @ensemble_kernel(%arg0: memref<2x1024xf32, #tpu.memory_space<vmem>>, %arg1: memref<1024x4xf32, #tpu.memory_space<vmem>>, %arg2: memref<1x4xf32, #tpu.memory_space<vmem>>, %arg3: memref<2x4xf32, #tpu.memory_space<vmem>>) attributes {dimension_semantics = [], scalar_prefetch = 0 : i64, scratch_operands = 0 : i64, tpu.core_type = #tpu.core_type<tc>} {
    %c0 = arith.constant 0 : index
    %c0_0 = arith.constant 0 : index
    %0 = vector.load %arg0[%c0, %c0_0] : memref<2x1024xf32, #tpu.memory_space<vmem>>, vector<2x1024xf32>
    %c0_1 = arith.constant 0 : index
    %c0_2 = arith.constant 0 : index
    %1 = vector.load %arg1[%c0_1, %c0_2] : memref<1024x4xf32, #tpu.memory_space<vmem>>, vector<1024x4xf32>
    %cst = arith.constant dense<0.000000e+00> : vector<2x4xf32>
    %2 = tpu.matmul %0, %1, %cst {dimension_numbers = #tpu.dot_dimension_numbers<[1], [0], [0], [1], [0, 0, 1, 1], [], []>} : vector<2x1024xf32>, vector<1024x4xf32>, vector<2x4xf32> -> vector<2x4xf32>
    %c0_3 = arith.constant 0 : index
    %c0_4 = arith.constant 0 : index
    %3 = vector.load %arg2[%c0_3, %c0_4] : memref<1x4xf32, #tpu.memory_space<vmem>>, vector<1x4xf32>
    %4 = vector.broadcast %3 : vector<1x4xf32> to vector<2x4xf32>
    %5 = arith.addf %2, %4 : vector<2x4xf32>
    %c0_5 = arith.constant 0 : index
    %c0_6 = arith.constant 0 : index
    %6 = vector.load %arg3[%c0_5, %c0_6] : memref<2x4xf32, #tpu.memory_space<vmem>>, vector<2x4xf32>
    tpu.vector_store %arg3[%c0_5, %c0_6], %5 {strides = array<i32>} : memref<2x4xf32, #tpu.memory_space<vmem>>, vector<2x4xf32>,
    return
  }
}

</mosaic_0001>

<bundles_post_ra>
// kernel: tpu_custom_call.1
= control target key start
LH: loop header
LB: loop body
LE: loop exit
PB: predicated region body
PF: predicated region fallthrough
CT: control target
= control target key end

     0   :  { %v659_v30 = vmov 1983009808   ;;  %v158_v32 = vlaneseq  ;;  %s1083_s0 = inlined_call_operand.vmem [shape: f32[2,1024], index: 0, kind: input, shape index: {}]   ;;  %s1084_s1 = inlined_call_operand.vmem [shape: f32[1024,4], index: 1, kind: input, shape index: {}]   ;;  %s1085_s2 = inlined_call_operand.vmem [shape: f32[1,4], index: 2, kind: input, shape index: {}]   ;;  %s1086_s3 = inlined_call_operand.hbm [shape: f32[2,4], index: 3, kind: output, shape index: {}]  }
   0x1   :  { %v48_v0 = vld [vmem:[%s1084_s1 + $0xf8] sm:$0xff]  ;;  %v47_v4 = vld [vmem:[%s1084_s1 + $0xf0] sm:$0xff]  ;;  %v46_v8 = vld [vmem:[%s1084_s1 + $0xe8] sm:$0xff]  ;;  %v156_v31 = vunpack.c.l.s4 %v659_v30 }
   0x2   :  { %v80_v1 = vld [vmem:[%s1084_s1 + $0x1f8] sm:$0xff]  ;;  %493 = vmatprep.subr.mxu0 %v48_v0  ;;  %v79_v5 = vld [vmem:[%s1084_s1 + $0x1f0] sm:$0xff]  ;;  %v78_v9 = vld [vmem:[%s1084_s1 + $0x1e8] sm:$0xff]  ;;  %v159_v42 = vshrl.u32 %v158_v32, 7 }
   0x3   :  { %v32_v2 = vld [vmem:[%s1084_s1 + $0x78] sm:$0xff]  ;;  %528 = vmatprep.subr.mxu1 %v80_v1  ;;  %v31_v6 = vld [vmem:[%s1084_s1 + $0x70] sm:$0xff]  ;;  %v30_v10 = vld [vmem:[%s1084_s1 + $0x68] sm:$0xff]  ;;  %v157_v41 = vunpack.c.0.s8 %v156_v31 }
   0x4   :  { %v64_v3 = vld [vmem:[%s1084_s1 + $0x178] sm:$0xff]  ;;  %494 = vmatpush3.msra.mxu0 %v32_v2  ;;  %v63_v7 = vld [vmem:[%s1084_s1 + $0x170] sm:$0xff]  ;;  %v62_v11 = vld [vmem:[%s1084_s1 + $0x168] sm:$0xff] }
   0x5   :  { %529 = vmatpush3.msra.mxu1 %v64_v3  ;;  %495 = vmatprep.subr.mxu0 %v47_v4  ;;  %v45_v12 = vld [vmem:[%s1084_s1 + $0xe0] sm:$0xff]  ;;  %v44_v16 = vld [vmem:[%s1084_s1 + $0xd8] sm:$0xff]  ;;  %v43_v20 = vld [vmem:[%s1084_s1 + $0xd0] sm:$0xff]  ;;  %v819_v51 = vsub.s32 %v157_v41, %v159_v42 }
   0x6   :  { %530 = vmatprep.subr.mxu1 %v79_v5  ;;  %496 = vmatpush3.msra.mxu0 %v31_v6  ;;  %v77_v13 = vld [vmem:[%s1084_s1 + $0x1e0] sm:$0xff]  ;;  %v76_v17 = vld [vmem:[%s1084_s1 + $0x1d8] sm:$0xff]  ;;  %v75_v21 = vld [vmem:[%s1084_s1 + $0x1d0] sm:$0xff] }
   0x7   :  { %531 = vmatpush3.msra.mxu1 %v63_v7  ;;  %497 = vmatprep.subr.mxu0 %v46_v8  ;;  %v29_v14 = vld [vmem:[%s1084_s1 + $0x60] sm:$0xff]  ;;  %v28_v18 = vld [vmem:[%s1084_s1 + $0x58] sm:$0xff]  ;;  %v27_v22 = vld [vmem:[%s1084_s1 + $0x50] sm:$0xff] }
   0x8   :  { %532 = vmatprep.subr.mxu1 %v78_v9  ;;  %v61_v15 = vld [vmem:[%s1084_s1 + $0x160] sm:$0xff]  ;;  %498 = vmatpush3.msra.mxu0 %v30_v10  ;;  %v60_v19 = vld [vmem:[%s1084_s1 + $0x158] sm:$0xff]  ;;  %v59_v23 = vld [vmem:[%s1084_s1 + $0x150] sm:$0xff] }
   0x9   :  { %533 = vmatpush3.msra.mxu1 %v62_v11  ;;  %499 = vmatprep.subr.mxu0 %v45_v12  ;;  %v42_v24 = vld [vmem:[%s1084_s1 + $0xc8] sm:$0xff]  ;;  %v41_v28 = vld [vmem:[%s1084_s1 + $0xc0] sm:$0xff]  ;;  %v40_v35 = vld [vmem:[%s1084_s1 + $0xb8] sm:$0xff] }
   0xa   :  { %534 = vmatprep.subr.mxu1 %v77_v13  ;;  %500 = vmatpush3.msra.mxu0 %v29_v14  ;;  %v74_v25 = vld [vmem:[%s1084_s1 + $0x1c8] sm:$0xff]  ;;  %v73_v29 = vld [vmem:[%s1084_s1 + $0x1c0] sm:$0xff]  ;;  %v72_v36 = vld [vmem:[%s1084_s1 + $0x1b8] sm:$0xff] }
   0xb   :  { %535 = vmatpush3.msra.mxu1 %v61_v15  ;;  %501 = vmatprep.subr.mxu0 %v44_v16  ;;  %v26_v26 = vld [vmem:[%s1084_s1 + $0x48] sm:$0xff]  ;;  %v25_v33 = vld [vmem:[%s1084_s1 + $0x40] sm:$0xff]  ;;  %v24_v37 = vld [vmem:[%s1084_s1 + $0x38] sm:$0xff] }
   0xc   :  { %536 = vmatprep.subr.mxu1 %v76_v17  ;;  %502 = vmatpush3.msra.mxu0 %v28_v18  ;;  %v58_v27 = vld [vmem:[%s1084_s1 + $0x148] sm:$0xff]  ;;  %v57_v34 = vld [vmem:[%s1084_s1 + $0x140] sm:$0xff]  ;;  %v56_v38 = vld [vmem:[%s1084_s1 + $0x138] sm:$0xff] }
   0xd   :  { %537 = vmatpush3.msra.mxu1 %v60_v19  ;;  %503 = vmatprep.subr.mxu0 %v43_v20  ;;  %v39_v39 = vld [vmem:[%s1084_s1 + $0xb0] sm:$0xff]  ;;  %v38_v45 = vld [vmem:[%s1084_s1 + $0xa8] sm:$0xff]  ;;  %v37_v49 = vld [vmem:[%s1084_s1 + $0xa0] sm:$0xff] }
   0xe   :  { %538 = vmatprep.subr.mxu1 %v75_v21  ;;  %504 = vmatpush3.msra.mxu0 %v27_v22  ;;  %v71_v40 = vld [vmem:[%s1084_s1 + $0x1b0] sm:$0xff]  ;;  %v70_v46 = vld [vmem:[%s1084_s1 + $0x1a8] sm:$0xff]  ;;  %v69_v50 = vld [vmem:[%s1084_s1 + $0x1a0] sm:$0xff] }
   0xf   :  { %539 = vmatpush3.msra.mxu1 %v59_v23  ;;  %505 = vmatprep.subr.mxu0 %v42_v24  ;;  %v23_v43 = vld [vmem:[%s1084_s1 + $0x30] sm:$0xff]  ;;  %v22_v47 = vld [vmem:[%s1084_s1 + $0x28] sm:$0xff]  ;;  %v21_v52 = vld [vmem:[%s1084_s1 + $0x20] sm:$0xff] }
  0x10   :  { %540 = vmatprep.subr.mxu1 %v74_v25  ;;  %506 = vmatpush3.msra.mxu0 %v26_v26  ;;  %v55_v44 = vld [vmem:[%s1084_s1 + $0x130] sm:$0xff]  ;;  %v54_v48 = vld [vmem:[%s1084_s1 + $0x128] sm:$0xff]  ;;  %v53_v53 = vld [vmem:[%s1084_s1 + $0x120] sm:$0xff] }
  0x11   :  { %541 = vmatpush3.msra.mxu1 %v58_v27  ;;  %507 = vmatprep.subr.mxu0 %v41_v28  ;;  %v15_v54 = vld [vmem:[%s1083_s0] sm:$0xff]  ;;  %v36_v55 = vld [vmem:[%s1084_s1 + $0x98] sm:$0xff]  ;;  %v35_v60 = vld [vmem:[%s1084_s1 + $0x90] sm:$0xff] }
  0x12   :  { %542 = vmatprep.subr.mxu1 %v73_v29  ;;  %508 = vmatpush3.msra.mxu0 %v25_v33  ;;  %v68_v56 = vld [vmem:[%s1084_s1 + $0x198] sm:$0xff]  ;;  %v154_v57 = vcombine.high %v15_v54, %v15_v54  ;;  %v67_v61 = vld [vmem:[%s1084_s1 + $0x190] sm:$0xff]  ;;  %v161_v62 = vrot.slane %v15_v54, %v819_v51  ;;  %v34_v1 = vld [vmem:[%s1084_s1 + $0x88] sm:$0xff] }
  0x13   :  { %543 = vmatpush3.msra.mxu1 %v57_v34  ;;  %509 = vmatprep.subr.mxu0 %v40_v35  ;;  %v20_v58 = vld [vmem:[%s1084_s1 + $0x18] sm:$0xff]  ;;  %v19_v63 = vld [vmem:[%s1084_s1 + $0x10] sm:$0xff]  ;;  %v66_v2 = vld [vmem:[%s1084_s1 + $0x188] sm:$0xff] }
  0x14   :  { %544 = vmatprep.subr.mxu1 %v72_v36  ;;  %510 = vmatpush3.msra.mxu0 %v24_v37  ;;  %v52_v59 = vld [vmem:[%s1084_s1 + $0x118] sm:$0xff]  ;;  %v51_v0 = vld [vmem:[%s1084_s1 + $0x110] sm:$0xff]  ;;  %v168_v3 = vrot.slane %v154_v57, %v819_v51  ;;  %v18_v4 = vld [vmem:[%s1084_s1 + $0x8] sm:$0xff]  ;;  %v169_v8 = vcombine.high %v161_v62, %v161_v62 }
  0x15   :  { %545 = vmatpush3.msra.mxu1 %v56_v38  ;;  %511 = vmatprep.subr.mxu0 %v39_v39  ;;  %v50_v5 = vld [vmem:[%s1084_s1 + $0x108] sm:$0xff]  ;;  %v33_v6 = vld [vmem:[%s1084_s1 + $0x80] sm:$0xff]  ;;  %v112_v12 = vld [vmem:[%s1084_s1 + $0x2f8] sm:$0xff] }
  0x16   :  { %546 = vmatprep.subr.mxu1 %v71_v40  ;;  %512 = vmatpush3.msra.mxu0 %v23_v43  ;;  %v65_v7 = vld [vmem:[%s1084_s1 + $0x180] sm:$0xff]  ;;  %v170_v11 = vcombine.high %v168_v3, %v168_v3  ;;  %v144_v13 = vld [vmem:[%s1084_s1 + $0x3f8] sm:$0xff]  ;;  %v111_v16 = vld [vmem:[%s1084_s1 + $0x2f0] sm:$0xff] }
  0x17   :  { %547 = vmatpush3.msra.mxu1 %v55_v44  ;;  %513 = vmatprep.subr.mxu0 %v38_v45  ;;  %v17_v9 = vld [vmem:[%s1084_s1] sm:$0xff]  ;;  %v96_v14 = vld [vmem:[%s1084_s1 + $0x278] sm:$0xff]  ;;  %v143_v17 = vld [vmem:[%s1084_s1 + $0x3f0] sm:$0xff] }
  0x18   :  { %548 = vmatprep.subr.mxu1 %v70_v46  ;;  %514 = vmatpush3.msra.mxu0 %v22_v47  ;;  %v49_v10 = vld [vmem:[%s1084_s1 + $0x100] sm:$0xff]  ;;  %v128_v15 = vld [vmem:[%s1084_s1 + $0x378] sm:$0xff]  ;;  %v95_v18 = vld [vmem:[%s1084_s1 + $0x270] sm:$0xff] }
  0x19   :  { %549 = vmatpush3.msra.mxu1 %v54_v48  ;;  %515 = vmatprep.subr.mxu0 %v37_v49  ;;  %v127_v19 = vld [vmem:[%s1084_s1 + $0x370] sm:$0xff]  ;;  %v110_v20 = vld [vmem:[%s1084_s1 + $0x2e8] sm:$0xff]  ;;  %v109_v24 = vld [vmem:[%s1084_s1 + $0x2e0] sm:$0xff] }
  0x1a   :  { %550 = vmatprep.subr.mxu1 %v69_v50  ;;  %516 = vmatpush3.msra.mxu0 %v21_v52  ;;  %v142_v21 = vld [vmem:[%s1084_s1 + $0x3e8] sm:$0xff]  ;;  %v141_v25 = vld [vmem:[%s1084_s1 + $0x3e0] sm:$0xff]  ;;  %v108_v28 = vld [vmem:[%s1084_s1 + $0x2d8] sm:$0xff] }
  0x1b   :  { %551 = vmatpush3.msra.mxu1 %v53_v53  ;;  %517 = vmatprep.subr.mxu0 %v36_v55  ;;  %v94_v22 = vld [vmem:[%s1084_s1 + $0x268] sm:$0xff]  ;;  %v93_v26 = vld [vmem:[%s1084_s1 + $0x260] sm:$0xff]  ;;  %v140_v29 = vld [vmem:[%s1084_s1 + $0x3d8] sm:$0xff] }
  0x1c   :  { %552 = vmatprep.subr.mxu1 %v68_v56  ;;  %518 = vmatpush3.msra.mxu0 %v20_v58  ;;  %v126_v23 = vld [vmem:[%s1084_s1 + $0x368] sm:$0xff]  ;;  %v125_v27 = vld [vmem:[%s1084_s1 + $0x360] sm:$0xff]  ;;  %v92_v30 = vld [vmem:[%s1084_s1 + $0x258] sm:$0xff] }
  0x1d   :  { %553 = vmatpush3.msra.mxu1 %v52_v59  ;;  %519 = vmatprep.subr.mxu0 %v35_v60  ;;  %v124_v31 = vld [vmem:[%s1084_s1 + $0x358] sm:$0xff]  ;;  %v107_v32 = vld [vmem:[%s1084_s1 + $0x2d0] sm:$0xff] }
  0x1e   :  { %554 = vmatprep.subr.mxu1 %v67_v61  ;;  %520 = vmatpush3.msra.mxu0 %v19_v63  ;;  %v139_v33 = vld [vmem:[%s1084_s1 + $0x3d0] sm:$0xff] }
  0x1f   :  { %555 = vmatpush3.msra.mxu1 %v51_v0  ;;  %521 = vmatprep.subr.mxu0 %v34_v1  ;;  %v91_v34 = vld [vmem:[%s1084_s1 + $0x250] sm:$0xff] }
  0x20   :  { %556 = vmatprep.subr.mxu1 %v66_v2  ;;  %522 = vmatpush3.msra.mxu0 %v18_v4  ;;  %v123_v35 = vld [vmem:[%s1084_s1 + $0x350] sm:$0xff] }
  0x21   :  { %557 = vmatpush3.msra.mxu1 %v50_v5  ;;  %523 = vmatprep.subr.mxu0 %v33_v6 }
  0x22   :  { %558 = vmatprep.subr.mxu1 %v65_v7  ;;  %524 = vmatpush3.msra.mxu0 %v17_v9 }
  0x23   :  { %260 = vmatprep.mubr.f32.mxu0 %v169_v8  ;;  %559 = vmatpush3.msra.mxu1 %v49_v10 }
  0x24   :  { %261 = vmatmul.mubr.f32.vlgmr.msra.gmra.mxu0 %v161_v62  ;;  %330 = vmatprep.mubr.f32.mxu1 %v170_v11 }
  0x25   :  { %563 = vmatprep.subr.mxu0 %v112_v12  ;;  %598 = vmatprep.subr.mxu1 %v144_v13 }
  0x26   :  { %331 = vmatmul.mubr.f32.vlgmr.msra.gmra.mxu1 %v168_v3  ;;  %564 = vmatpush3.msra.mxu0 %v96_v14 }
  0x27   :  { %599 = vmatpush3.msra.mxu1 %v128_v15  ;;  %565 = vmatprep.subr.mxu0 %v111_v16 }
  0x28   :  { %600 = vmatprep.subr.mxu1 %v143_v17  ;;  %566 = vmatpush3.msra.mxu0 %v95_v18 }
  0x29   :  { %601 = vmatpush3.msra.mxu1 %v127_v19  ;;  %567 = vmatprep.subr.mxu0 %v110_v20 }
  0x2a   :  { %602 = vmatprep.subr.mxu1 %v142_v21  ;;  %568 = vmatpush3.msra.mxu0 %v94_v22 }
  0x2b   :  { %603 = vmatpush3.msra.mxu1 %v126_v23  ;;  %569 = vmatprep.subr.mxu0 %v109_v24 }
  0x2c   :  { %604 = vmatprep.subr.mxu1 %v141_v25  ;;  %570 = vmatpush3.msra.mxu0 %v93_v26 }
  0x2d   :  { %605 = vmatpush3.msra.mxu1 %v125_v27  ;;  %571 = vmatprep.subr.mxu0 %v108_v28 }
  0x2e   :  { %606 = vmatprep.subr.mxu1 %v140_v29 }
  0x2f   :  { %8 = vsyncpa [#allocation3], 0  ;;  %572 = vmatpush3.msra.mxu0 %v92_v30  ;;  %607 = vmatpush3.msra.mxu1 %v124_v31  ;;  %v106_v36 = vld [vmem:[%s1084_s1 + $0x2c8] sm:$0xff]  ;;  %v105_v40 = vld [vmem:[%s1084_s1 + $0x2c0] sm:$0xff]  ;;  %vm476_vm0 = vcmask 25600  }
  0x30   :  { %v138_v37 = vld [vmem:[%s1084_s1 + $0x3c8] sm:$0xff]  ;;  %573 = vmatprep.subr.mxu0 %v107_v32  ;;  %608 = vmatprep.subr.mxu1 %v139_v33  ;;  %v137_v41 = vld [vmem:[%s1084_s1 + $0x3c0] sm:$0xff]  ;;  %v104_v44 = vld [vmem:[%s1084_s1 + $0x2b8] sm:$0xff] }
  0x31   :  { %v90_v38 = vld [vmem:[%s1084_s1 + $0x248] sm:$0xff]  ;;  %574 = vmatpush3.msra.mxu0 %v91_v34  ;;  %609 = vmatpush3.msra.mxu1 %v123_v35  ;;  %v89_v42 = vld [vmem:[%s1084_s1 + $0x240] sm:$0xff]  ;;  %v136_v45 = vld [vmem:[%s1084_s1 + $0x3b8] sm:$0xff] }
  0x32   :  { %v122_v39 = vld [vmem:[%s1084_s1 + $0x348] sm:$0xff]  ;;  %575 = vmatprep.subr.mxu0 %v106_v36  ;;  %610 = vmatprep.subr.mxu1 %v138_v37  ;;  %v121_v43 = vld [vmem:[%s1084_s1 + $0x340] sm:$0xff]  ;;  %v88_v46 = vld [vmem:[%s1084_s1 + $0x238] sm:$0xff] }
  0x33   :  { %576 = vmatpush3.msra.mxu0 %v90_v38  ;;  %611 = vmatpush3.msra.mxu1 %v122_v39  ;;  %v120_v47 = vld [vmem:[%s1084_s1 + $0x338] sm:$0xff]  ;;  %v103_v48 = vld [vmem:[%s1084_s1 + $0x2b0] sm:$0xff]  ;;  %v102_v53 = vld [vmem:[%s1084_s1 + $0x2a8] sm:$0xff] }
  0x34   :  { %577 = vmatprep.subr.mxu0 %v105_v40  ;;  %612 = vmatprep.subr.mxu1 %v137_v41  ;;  %v135_v49 = vld [vmem:[%s1084_s1 + $0x3b0] sm:$0xff]  ;;  %v134_v54 = vld [vmem:[%s1084_s1 + $0x3a8] sm:$0xff]  ;;  %v101_v58 = vld [vmem:[%s1084_s1 + $0x2a0] sm:$0xff] }
  0x35   :  { %578 = vmatpush3.msra.mxu0 %v89_v42  ;;  %613 = vmatpush3.msra.mxu1 %v121_v43  ;;  %v87_v50 = vld [vmem:[%s1084_s1 + $0x230] sm:$0xff]  ;;  %v16_v55 = vld [vmem:[%s1083_s0 + $0x8] sm:$0xff]  ;;  %v133_v59 = vld [vmem:[%s1084_s1 + $0x3a0] sm:$0xff] }
  0x36   :  { %579 = vmatprep.subr.mxu0 %v104_v44  ;;  %614 = vmatprep.subr.mxu1 %v136_v45  ;;  %v119_v52 = vld [vmem:[%s1084_s1 + $0x330] sm:$0xff]  ;;  %v86_v56 = vld [vmem:[%s1084_s1 + $0x228] sm:$0xff]  ;;  %v85_v60 = vld [vmem:[%s1084_s1 + $0x220] sm:$0xff]  ;;  %v171_v62 = vcombine.high %v16_v55, %v16_v55  ;;  %v178_v5 = vrot.slane %v16_v55, %v819_v51 }
  0x37   :  { %580 = vmatpush3.msra.mxu0 %v88_v46  ;;  %615 = vmatpush3.msra.mxu1 %v120_v47  ;;  %v118_v57 = vld [vmem:[%s1084_s1 + $0x328] sm:$0xff]  ;;  %v117_v61 = vld [vmem:[%s1084_s1 + $0x320] sm:$0xff]  ;;  %v100_v63 = vld [vmem:[%s1084_s1 + $0x298] sm:$0xff] }
  0x38   :  { %581 = vmatprep.subr.mxu0 %v103_v48  ;;  %616 = vmatprep.subr.mxu1 %v135_v49  ;;  %v132_v0 = vld [vmem:[%s1084_s1 + $0x398] sm:$0xff]  ;;  %v99_v3 = vld [vmem:[%s1084_s1 + $0x290] sm:$0xff]  ;;  %v185_v8 = vrot.slane %v171_v62, %v819_v51  ;;  %v98_v9 = vld [vmem:[%s1084_s1 + $0x288] sm:$0xff]  ;;  %v186_v14 = vcombine.high %v178_v5, %v178_v5 }
  0x39   :  { %582 = vmatpush3.msra.mxu0 %v87_v50  ;;  %617 = vmatpush3.msra.mxu1 %v119_v52  ;;  %v84_v1 = vld [vmem:[%s1084_s1 + $0x218] sm:$0xff]  ;;  %v131_v4 = vld [vmem:[%s1084_s1 + $0x390] sm:$0xff]  ;;  %v130_v10 = vld [vmem:[%s1084_s1 + $0x388] sm:$0xff] }
  0x3a   :  { %583 = vmatprep.subr.mxu0 %v102_v53  ;;  %618 = vmatprep.subr.mxu1 %v134_v54  ;;  %v116_v2 = vld [vmem:[%s1084_s1 + $0x318] sm:$0xff]  ;;  %v83_v6 = vld [vmem:[%s1084_s1 + $0x210] sm:$0xff]  ;;  %v82_v11 = vld [vmem:[%s1084_s1 + $0x208] sm:$0xff]  ;;  %v187_v16 = vcombine.high %v185_v8, %v185_v8 }
  0x3b   :  { %584 = vmatpush3.msra.mxu0 %v86_v56  ;;  %619 = vmatpush3.msra.mxu1 %v118_v57  ;;  %v115_v7 = vld [vmem:[%s1084_s1 + $0x310] sm:$0xff]  ;;  %v114_v51 = vld [vmem:[%s1084_s1 + $0x308] sm:$0xff]  ;;  %v97_v12 = vld [vmem:[%s1084_s1 + $0x280] sm:$0xff] }
  0x3c   :  { %585 = vmatprep.subr.mxu0 %v101_v58  ;;  %620 = vmatprep.subr.mxu1 %v133_v59  ;;  %v129_v13 = vld [vmem:[%s1084_s1 + $0x380] sm:$0xff] }
  0x3d   :  { %586 = vmatpush3.msra.mxu0 %v85_v60  ;;  %621 = vmatpush3.msra.mxu1 %v117_v61  ;;  %v81_v15 = vld [vmem:[%s1084_s1 + $0x200] sm:$0xff] }
  0x3e   :  { %587 = vmatprep.subr.mxu0 %v100_v63  ;;  %622 = vmatprep.subr.mxu1 %v132_v0  ;;  %v113_v17 = vld [vmem:[%s1084_s1 + $0x300] sm:$0xff]  ;;  %s660_s1 = smov [#allocation2]  }
  0x3f   :  { %588 = vmatpush3.msra.mxu0 %v84_v1  ;;  %623 = vmatpush3.msra.mxu1 %v116_v2  ;;  %v492_v22 = vld [vmem:[%s1085_s2] ss:$0 sm:$0xff]  ;;  %s484_s29 = sshll.u32 %s660_s1, 4  ;;  %s485_s29 = int_to_ptr.vmem [resolvable:$true] %s484_s29 }
  0x40   :  { %589 = vmatprep.subr.mxu0 %v99_v3  ;;  %624 = vmatprep.subr.mxu1 %v131_v4  ;;  %s637_s30 = scalar_lea.vmem %s485_s29, 32  ;;  %p642_p1 = scmp.lt.s32.totalorder %s485_s29, %s485_s29 }
  0x41   :  { %590 = vmatpush3.msra.mxu0 %v83_v6  ;;  %625 = vmatpush3.msra.mxu1 %v115_v7  ;;  %p638_p0 = scmp.ne.s32.totalorder %s485_s29, %s637_s30  ;;  %p643_p2 = scmp.lt.s32.totalorder %s637_s30, %s637_s30 }
  0x42   :  { %591 = vmatprep.subr.mxu0 %v98_v9  ;;  %626 = vmatprep.subr.mxu1 %v130_v10 }
  0x43   :  { %592 = vmatpush3.msra.mxu0 %v82_v11  ;;  %627 = vmatpush3.msra.mxu1 %v114_v51  ;;  %p644_p3 = por %p643_p2, %p642_p1 }
  0x44   :  { %593 = vmatprep.subr.mxu0 %v97_v12  ;;  %628 = vmatprep.subr.mxu1 %v129_v13 }
  0x45   :  { %594 = vmatpush3.msra.mxu0 %v81_v15  ;;  %400 = vmatprep.mubr.f32.mxu0 %v186_v14  ;;  %p645_p4 = pnand %p644_p3, %p638_p0 }
  0x46   :  { %629 = vmatpush3.msra.mxu1 %v113_v17  ;;  %470 = vmatprep.mubr.f32.mxu1 %v187_v16 }
  0x47   :  { %401 = vmatmul.mubr.f32.vlgmr.msra.gmra.mxu0 %v178_v5  ;;  %471 = vmatmul.mubr.f32.vlgmr.msra.gmra.mxu1 %v185_v8 }
  0xe4   :  { %v525_v18 = vpop.f32.mrf.mxu0 }
  0xe6   :  { %v560_v19 = vpop.f32.mrf.mxu1  ;;  %v526_v20 = vpop.f32.mrf.mxu0 }
  0xe7   :  { %v527_v21 = vadd.f32 %v526_v20, %v525_v18 }
  0xe8   :  { %v561_v23 = vpop.f32.mrf.mxu1 }
  0xe9   :  { %v263_v24 = vadd.f32 %v527_v21, %v492_v22  ;;  %v562_v25 = vadd.f32 %v561_v23, %v560_v19 }
  0xeb   :  { %v333_v30 = vadd.f32 %v562_v25, %v263_v24 }
 0x107   :  { %v595_v26 = vpop.f32.mrf.mxu0  ;;  %v630_v27 = vpop.f32.mrf.mxu1 }
 0x109   :  { %v596_v28 = vpop.f32.mrf.mxu0  ;;  %v631_v29 = vpop.f32.mrf.mxu1 }
 0x10a   :  { %v597_v31 = vadd.f32 %v596_v28, %v595_v26  ;;  %v632_v33 = vadd.f32 %v631_v29, %v630_v27 }
 0x10c   :  { %v403_v32 = vadd.f32 %v597_v31, %v333_v30 }
 0x10e   :  { %v473_v34 = vadd.f32 %v632_v33, %v403_v32 }
 0x110   :  { %477 = vst.msk [vmem:[#allocation2] sm:$0x3] %vm476_vm0, %v473_v34 }
 0x111   :  { %648 = shalt.err (!%p645_p4)
}
 0x112   :  { %487 = dma.vmem_to_hbm [thread:$0]  %s485_s29, 32, %s1086_s3, [#allocation3]  }
 0x113   :  { %657 = dma.done.wait [#allocation3], 32  }
 0x114   :  { %658 = vsyncadd [#allocation3], 4294967264 }
 0x115   :  { %491 = vsyncpa [#allocation3], 1 }

</bundles_post_ra>
